<compile_context>
chip_gen: v7x
topology: tpu7x:2x2x1
jax: 0.10.0
libtpu: 0.0.40
codegen_flags: <defaults>
</compile_context>

<pallas_src>
import functools
import math

import jax
import jax.numpy as jnp
from jax import lax
from jax.experimental import pallas as pl
from jax.experimental.pallas import tpu as pltpu


_NEG_LARGE = -1e30  # padding value for extra matching candidates (columns)


def _round_up(x: int, m: int) -> int:
    return ((x + m - 1) // m) * m


def _cdiv(a: int, b: int) -> int:
    return -(-a // b)


def _device_kind() -> str:
    try:
        return jax.devices()[0].device_kind.lower()
    except Exception:  # pragma: no cover - defensive
        return "unknown"


def _tpu_gen_info():
    """Per-generation heuristics: scoped-VMEM budget, cores/chip, bf16 EUP."""
    kind = _device_kind()
    if "v7" in kind:
        # 64 MiB physical VMEM per TensorCore -> keep a tighter budget.
        return {"vmem_budget": 40 << 20, "cores": 2, "bf16_eup": True}
    if "v6" in kind:
        return {"vmem_budget": 96 << 20, "cores": 1, "bf16_eup": True}
    if "v5 lite" in kind or "v5e" in kind or "v5lite" in kind:
        return {"vmem_budget": 96 << 20, "cores": 1, "bf16_eup": False}
    # unknown backend (incl. CPU interpret): conservative defaults
    return {"vmem_budget": 40 << 20, "cores": 1, "bf16_eup": False}


# ----------------------------------------------------------------------------
# Kernel 1: forward(return_soft=True)
#   gumbel = -log(-log(U + 1e-8) + 1e-8),  U ~ uniform(0,1) (passed in)
#   out    = softmax((scores + gumbel) / temperature, dim=1)
# ----------------------------------------------------------------------------
def _gumbel_softmax_kernel(invt_ref, scores_ref, noise_ref, out_ref, *,
                           noise_log_dtype):
    u = noise_ref[...]
    # The two logs dominate the EUP cost; on bf16-EUP generations they run in
    # bf16 (noise does not need f32 precision), softmax math stays f32.
    x = (u + 1e-8).astype(noise_log_dtype)
    inner = -jnp.log(x)
    gumbel = (-jnp.log(inner + jnp.asarray(1e-8, noise_log_dtype))
              ).astype(jnp.float32)

    inv_t = invt_ref[0]
    logits = (scores_ref[...].astype(jnp.float32) + gumbel) * inv_t

    # numerically-stable softmax over dim=1 (lanes)
    m = jnp.max(logits, axis=1, keepdims=True)
    e = jnp.exp(logits - m)
    denom = jnp.sum(e, axis=1, keepdims=True)
    out_ref[...] = (e * (1.0 / denom)).astype(out_ref.dtype)


def gumbel_softmax_matching(scores: jax.Array, key: jax.Array,
                            temperature: float = 0.1, *,
                            block_rows: int = 512,
                            fast_noise: bool | None = None,
                            return_noise: bool = False):
    """return_soft=True path.

    `key` is a jax PRNG key used host-side for the uniform noise.
    fast_noise=None auto-enables bf16 Gumbel logs on bf16-EUP generations.
    If return_noise=True, also returns the uniform noise (for validation).
    """
    n1, n2 = scores.shape
    out_dtype = scores.dtype
    info = _tpu_gen_info()
    if fast_noise is None:
        fast_noise = info["bf16_eup"]
    noise_log_dtype = jnp.bfloat16 if fast_noise else jnp.float32

    # pad N2 to a lane-dense multiple of 128; padded candidates get -1e30 so
    # the row softmax ignores them.  Padded rows are sliced off afterwards.
    n2p = _round_up(n2, 128)

    # Row-tile sizing:
    #  * the block (scores + noise in, out; double-buffered f32) must fit the
    #    per-generation scoped-VMEM budget,
    #  * tiles divide n1 tightly (no near-doubling of padded rows),
    #  * on 2-core chips (v7x) create >= 2 grid steps so "parallel" sharding
    #    gives both TensorCores work.
    bytes_per_row = n2p * 4 * (2 + 2 + 2)
    vmem_rows = max(8, (info["vmem_budget"] // 2) // bytes_per_row)
    block_rows = max(8, min(block_rows, vmem_rows))
    n_tiles = max(1, _cdiv(n1, block_rows))
    if info["cores"] > 1 and n1 > 8:
        n_tiles = max(n_tiles, info["cores"])
    tm = _round_up(_cdiv(n1, n_tiles), 8)
    n1p = _round_up(n1, tm)

    noise = jax.random.uniform(key, (n1p, n2p), dtype=jnp.float32)
    if (n1p, n2p) != (n1, n2):
        scores_p = jnp.pad(scores, ((0, n1p - n1), (0, n2p - n2)),
                           constant_values=_NEG_LARGE)
    else:
        scores_p = scores

    invt_arr = jnp.asarray([1.0 / temperature], dtype=jnp.float32)
    kernel = functools.partial(_gumbel_softmax_kernel,
                               noise_log_dtype=noise_log_dtype)

    soft = pl.pallas_call(
        kernel,
        grid=(n1p // tm,),
        in_specs=[
            pl.BlockSpec(memory_space=pltpu.MemorySpace.SMEM),  # 1/temp f32[1]
            pl.BlockSpec((tm, n2p), lambda i: (i, 0)),          # scores tile
            pl.BlockSpec((tm, n2p), lambda i: (i, 0)),          # uniform noise
        ],
        out_specs=pl.BlockSpec((tm, n2p), lambda i: (i, 0)),
        out_shape=jax.ShapeDtypeStruct((n1p, n2p), out_dtype),
        compiler_params=pltpu.CompilerParams(
            dimension_semantics=("parallel",),
            vmem_limit_bytes=info["vmem_budget"]),
    )(invt_arr, scores_p, noise)

    soft = soft[:n1, :n2]
    if return_noise:
        return soft, noise[:n1, :n2]
    return soft


# ----------------------------------------------------------------------------
# Kernel 2: forward(return_soft=False) -> hungarian_assignment
#   log_alpha = scores / temperature
#   repeat 20x: row-normalize (logsumexp dim=1), col-normalize (logsumexp dim=0)
#   return exp(log_alpha)
#
# EUP optimization: the row-softmax numerator e = exp(la - m_row) is reused
# for the column logsumexp -- P = e / s_row == exp(row-normalized la) is in
# (0, 1], so the column lse is just log(sum(P, axis=0)) (an N2-vector log),
# i.e. ONE full-size exp per iteration instead of two.  The final exp(la) is
# emitted as P * exp(-col_lse) (N2-vector exp), removing the closing full-size
# exp as well.
# ----------------------------------------------------------------------------
def _sinkhorn_kernel(invt_ref, scores_ref, out_ref, *, n_iters: int):
    la = scores_ref[...].astype(jnp.float32) * invt_ref[0]

    def step(la):
        m_row = jnp.max(la, axis=1, keepdims=True)
        e = jnp.exp(la - m_row)                       # the only full-size exp
        s_row = jnp.sum(e, axis=1, keepdims=True)
        p = e * (1.0 / s_row)                         # == exp(la - row_lse)
        col_sum = jnp.sum(p, axis=0, keepdims=True)   # p <= 1 -> no overflow
        lse_col = jnp.log(col_sum)                    # N2-vector log
        return p, lse_col, m_row, s_row

    def body(_, la):
        p, lse_col, m_row, s_row = step(la)
        row_lse = m_row + jnp.log(s_row)              # N1-vector log
        return (la - row_lse) - lse_col

    if n_iters > 1:
        # serial dependence across iterations -> modest unroll only
        la = lax.fori_loop(0, n_iters - 1, body, la, unroll=2)
    # last iteration: output = exp(la - row_lse - lse_col) = p * exp(-lse_col)
    p, lse_col, _, _ = step(la)
    out_ref[...] = (p * jnp.exp(-lse_col)).astype(out_ref.dtype)


def hungarian_assignment(scores: jax.Array, temperature: float = 0.1,
                         n_iters: int = 20) -> jax.Array:
    """return_soft=False path (Sinkhorn approximate Hungarian).

    Whole matrix stays VMEM-resident (row/col coupling prevents tiling).
    NOTE: if n2 is not a multiple of 128 the stores are lane-masked (correct,
    slightly slower); padding would require re-masking inside every iteration.
    """
    n1, n2 = scores.shape
    info = _tpu_gen_info()
    budget = info["vmem_budget"]

    # in block (2 bufs) + out block (2 bufs) in the input dtype, plus ~4
    # full-size f32 temporaries live inside the (unroll=2) loop.
    itemsize = jnp.dtype(scores.dtype).itemsize
    est_bytes = n1 * n2 * (4 * itemsize + 4 * 4)
    if est_bytes > budget:
        # TODO(synk): blocked/masked two-pass Sinkhorn for matrices > VMEM.
        raise ValueError(
            f"scores {n1}x{n2} too large for single-block Sinkhorn "
            f"(needs ~{est_bytes} B of VMEM, budget {budget} B)")

    invt_arr = jnp.asarray([1.0 / temperature], dtype=jnp.float32)
    kernel = functools.partial(_sinkhorn_kernel, n_iters=n_iters)
    return pl.pallas_call(
        kernel,
        grid=(1,),
        out_shape=jax.ShapeDtypeStruct((n1, n2), scores.dtype),
        in_specs=[
            pl.BlockSpec(memory_space=pltpu.MemorySpace.SMEM),  # 1/temp f32[1]
            pl.BlockSpec((n1, n2), lambda i: (0, 0)),
        ],
        out_specs=pl.BlockSpec((n1, n2), lambda i: (0, 0)),
        compiler_params=pltpu.CompilerParams(vmem_limit_bytes=budget),
    )(invt_arr, scores)


# ----------------------------------------------------------------------------
# Pure-JAX references for correctness checking.
# ----------------------------------------------------------------------------
def _gumbel_softmax_ref(scores, u, temperature):
    gumbel = -jnp.log(-jnp.log(u + 1e-8) + 1e-8)
    inv_t = jnp.float32(1.0 / temperature)
    return jax.nn.softmax((scores + gumbel) * inv_t, axis=1)


def _sinkhorn_ref(scores, temperature, n_iters=20):
    la = scores / temperature
    for _ in range(n_iters):
        la = la - jax.scipy.special.logsumexp(la, axis=1, keepdims=True)
        la = la - jax.scipy.special.logsumexp(la, axis=0, keepdims=True)
    return jnp.exp(la)


if __name__ == "__main__":
    temperature = 0.1
    N1, N2 = 64, 128  # [N1, N2] matching-score matrix

    key = jax.random.PRNGKey(0)
    k_scores, k_noise, k_odd_scores, k_odd_noise = jax.random.split(key, 4)
    scores = jax.random.normal(k_scores, (N1, N2), dtype=jnp.float32)

    # --- return_soft=True path (Gumbel-softmax) ----------------------------
    soft, noise = gumbel_softmax_matching(scores, k_noise, temperature,
                                          fast_noise=False, return_noise=True)
    soft = jax.block_until_ready(soft)
    soft_ref = _gumbel_softmax_ref(scores, noise, temperature)
    assert bool(jnp.all(jnp.isfinite(soft))), "non-finite soft assignment"
    assert jnp.allclose(soft, soft_ref, atol=1e-4, rtol=1e-4), "soft mismatch"
    assert jnp.allclose(jnp.sum(soft, axis=1), 1.0, atol=1e-4), \
        "rows not normalized"

    # fast (bf16 Gumbel-log) variant: only enabled on bf16-EUP generations;
    # validity check only (numerics intentionally differ slightly).
    soft_fast = jax.block_until_ready(
        gumbel_softmax_matching(scores, k_noise, temperature))
    assert bool(jnp.all(jnp.isfinite(soft_fast))), "non-finite fast soft"
    assert jnp.allclose(jnp.sum(soft_fast, axis=1), 1.0, atol=1e-3), \
        "fast rows not normalized"

    # Non-aligned shape exercises padding (N2 -> 128) and a multi-tile grid.
    scores_odd = jax.random.normal(k_odd_scores, (50, 70), jnp.float32)
    soft_odd, noise_odd = gumbel_softmax_matching(
        scores_odd, k_odd_noise, temperature, block_rows=16,
        fast_noise=False, return_noise=True)
    soft_odd = jax.block_until_ready(soft_odd)
    soft_odd_ref = _gumbel_softmax_ref(scores_odd, noise_odd, temperature)
    assert jnp.allclose(soft_odd, soft_odd_ref, atol=1e-4, rtol=1e-4), \
        "padded soft mismatch"
    assert jnp.allclose(jnp.sum(soft_odd, axis=1), 1.0, atol=1e-4)

    # --- return_soft=False path (Sinkhorn approximate Hungarian) -----------
    hard = jax.block_until_ready(hungarian_assignment(scores, temperature))
    hard_ref = _sinkhorn_ref(scores, temperature)
    assert bool(jnp.all(jnp.isfinite(hard))), "non-finite sinkhorn output"
    assert jnp.allclose(hard, hard_ref, atol=1e-4, rtol=1e-4), "sinkhorn mismatch"

    print("KERNEL_OK")
</pallas_src>

<mosaic_0001>
module attributes {stable_mosaic.version = 11 : i64} {
  func.func @_gumbel_softmax_kernel(%arg0: i32, %arg1: memref<1xf32, #tpu.memory_space<smem>>, %arg2: memref<64x128xf32, #tpu.memory_space<vmem>>, %arg3: memref<64x128xf32, #tpu.memory_space<vmem>>, %arg4: memref<64x128xf32, #tpu.memory_space<vmem>>) attributes {dimension_semantics = [#tpu.dimension_semantics<parallel>], iteration_bounds = array<i64: 1>, scalar_prefetch = 0 : i64, scratch_operands = 0 : i64, tpu.core_type = #tpu.core_type<tc>, window_params = [{transform_indices = @transform_0, window_bounds = array<i64: 1>}, {transform_indices = @transform_1, window_bounds = array<i64: 64, 128>}, {transform_indices = @transform_2, window_bounds = array<i64: 64, 128>}, {transform_indices = @transform_3, window_bounds = array<i64: 64, 128>}]} {
    %c0 = arith.constant 0 : index
    %c0_0 = arith.constant 0 : index
    %0 = vector.load %arg3[%c0, %c0_0] : memref<64x128xf32, #tpu.memory_space<vmem>>, vector<64x128xf32>
    %cst = arith.constant 9.99999993E-9 : f32
    %1 = vector.broadcast %cst : f32 to vector<64x128xf32>
    %2 = arith.addf %0, %1 : vector<64x128xf32>
    %3 = math.log %2 : vector<64x128xf32>
    %cst_1 = arith.constant 0.000000e+00 : f32
    %4 = vector.broadcast %cst_1 : f32 to vector<64x128xf32>
    %5 = arith.subf %4, %3 : vector<64x128xf32>
    %cst_2 = arith.constant 9.99999993E-9 : f32
    %6 = vector.broadcast %cst_2 : f32 to vector<64x128xf32>
    %7 = arith.addf %5, %6 : vector<64x128xf32>
    %8 = math.log %7 : vector<64x128xf32>
    %cst_3 = arith.constant 0.000000e+00 : f32
    %9 = vector.broadcast %cst_3 : f32 to vector<64x128xf32>
    %10 = arith.subf %9, %8 : vector<64x128xf32>
    %c0_4 = arith.constant 0 : index
    %11 = memref.load %arg1[%c0_4] : memref<1xf32, #tpu.memory_space<smem>>
    %c0_5 = arith.constant 0 : index
    %c0_6 = arith.constant 0 : index
    %12 = vector.load %arg2[%c0_5, %c0_6] : memref<64x128xf32, #tpu.memory_space<vmem>>, vector<64x128xf32>
    %13 = arith.addf %12, %10 : vector<64x128xf32>
    %14 = vector.broadcast %11 : f32 to vector<64x128xf32>
    %15 = arith.mulf %13, %14 : vector<64x128xf32>
    %cst_7 = arith.constant dense<0xFF800000> : vector<64xf32>
    %16 = vector.multi_reduction <maximumf>, %15, %cst_7 [1] : vector<64x128xf32> to vector<64xf32>
    %17 = vector.shape_cast %16 : vector<64xf32> to vector<64x1xf32>
    %18 = vector.broadcast %17 : vector<64x1xf32> to vector<64x128xf32>
    %19 = arith.subf %15, %18 : vector<64x128xf32>
    %20 = math.exp %19 : vector<64x128xf32>
    %cst_8 = arith.constant dense<0.000000e+00> : vector<64xf32>
    %21 = vector.multi_reduction <add>, %20, %cst_8 [1] : vector<64x128xf32> to vector<64xf32>
    %22 = vector.shape_cast %21 : vector<64xf32> to vector<64x1xf32>
    %cst_9 = arith.constant 1.000000e+00 : f32
    %23 = vector.broadcast %cst_9 : f32 to vector<64x1xf32>
    %24 = arith.divf %23, %22 : vector<64x1xf32>
    %25 = vector.broadcast %24 : vector<64x1xf32> to vector<64x128xf32>
    %26 = arith.mulf %20, %25 : vector<64x128xf32>
    %c0_10 = arith.constant 0 : index
    %c0_11 = arith.constant 0 : index
    %27 = vector.load %arg4[%c0_10, %c0_11] : memref<64x128xf32, #tpu.memory_space<vmem>>, vector<64x128xf32>
    tpu.vector_store %arg4[%c0_10, %c0_11], %26 {strides = array<i32>} : memref<64x128xf32, #tpu.memory_space<vmem>>, vector<64x128xf32>,
    return
  }
  func.func @transform_0(%arg0: i32) -> i32 {
    %c0_i32 = arith.constant 0 : i32
    %c0_i32_0 = arith.constant 0 : i32
    return %c0_i32 : i32
  }
  func.func @transform_1(%arg0: i32) -> (i32, i32) {
    %c0_i32 = arith.constant 0 : i32
    %c0_i32_0 = arith.constant 0 : i32
    return %arg0, %c0_i32 : i32, i32
  }
  func.func @transform_2(%arg0: i32) -> (i32, i32) {
    %c0_i32 = arith.constant 0 : i32
    %c0_i32_0 = arith.constant 0 : i32
    return %arg0, %c0_i32 : i32, i32
  }
  func.func @transform_3(%arg0: i32) -> (i32, i32) {
    %c0_i32 = arith.constant 0 : i32
    %c0_i32_0 = arith.constant 0 : i32
    return %arg0, %c0_i32 : i32, i32
  }
}

</mosaic_0001>

<bundles_post_ra>
// kernel: tpu_custom_call.1
= control target key start
LH: loop header
LB: loop body
LE: loop exit
PB: predicated region body
PF: predicated region fallthrough
CT: control target
= control target key end

     0   :  { %9 = vsyncpa [#allocation4], 0  ;;  %s462_s0 = inlined_call_operand.<no memory space> [shape: f32[1], index: 0, kind: input, shape index: {}]   ;;  %s463_s1 = inlined_call_operand.hbm [shape: f32[64,128], index: 1, kind: input, shape index: {}]   ;;  %s464_s2 = inlined_call_operand.hbm [shape: f32[64,128], index: 2, kind: input, shape index: {}]   ;;  %s465_s3 = inlined_call_operand.hbm [shape: f32[64,128], index: 3, kind: output, shape index: {}]  }
   0x1   :  { %10 = vsyncpa [#allocation7], 0 }
   0x2   :  { %11 = vsyncpa [#allocation5], 0  ;;  %s389_s12 = smov [#allocation3]   ;;  %s317_s16 = scalar_lea.hbm %s463_s1, 1024 }
   0x3   :  { %s19_s13 = sshll.u32 %s389_s12, 4  ;;  %p318_p0 = scmp.ne.s32.totalorder %s463_s1, %s317_s16  ;;  %s20_s13 = int_to_ptr.vmem [resolvable:$true] %s19_s13 }
   0x4   :  { %p321_p1 = scmp.lt.u32.totalorder %s317_s16, %s463_s1 }
   0x6   :  { %p323_p2 = pnand %p321_p1, %p318_p0 }
   0x8   :  { %326 = shalt.err (!%p323_p2)
}
   0x9   :  { %s327_s21 = scalar_lea.vmem %s20_s13, 1024  ;;  %p332_p4 = scmp.lt.s32.totalorder %s20_s13, %s20_s13 }
   0xa   :  { %p328_p3 = scmp.ne.s32.totalorder %s20_s13, %s327_s21  ;;  %p333_p5 = scmp.lt.s32.totalorder %s327_s21, %s327_s21 }
   0xc   :  { %p334_p6 = por %p333_p5, %p332_p4 }
   0xe   :  { %p335_p7 = pnand %p334_p6, %p328_p3 }
  0x10   :  { %338 = shalt.err (!%p335_p7)
}
  0x11   :  { %s390_s22 = smov 128   ;;  %s391_s23 = smov 8  }
  0x12   :  { %25 = dma.hbm_to_vmem [thread:$0]  %s463_s1, 1024, %s20_s13, [#allocation4], %s390_s22, %s390_s22, %s391_s23  }
  0x13   :  { %s392_s26 = smov [#allocation6]   ;;  %s339_s30 = scalar_lea.hbm %s464_s2, 1024 }
  0x14   :  { %s31_s27 = sshll.u32 %s392_s26, 4  ;;  %p340_p8 = scmp.ne.s32.totalorder %s464_s2, %s339_s30  ;;  %s32_s27 = int_to_ptr.vmem [resolvable:$true] %s31_s27 }
  0x15   :  { %p343_p9 = scmp.lt.u32.totalorder %s339_s30, %s464_s2 }
  0x17   :  { %p345_p10 = pnand %p343_p9, %p340_p8 }
  0x19   :  { %348 = shalt.err (!%p345_p10)
}
  0x1a   :  { %s349_s8 = scalar_lea.vmem %s32_s27, 1024  ;;  %p354_p12 = scmp.lt.s32.totalorder %s32_s27, %s32_s27 }
  0x1b   :  { %p350_p11 = scmp.ne.s32.totalorder %s32_s27, %s349_s8  ;;  %p355_p13 = scmp.lt.s32.totalorder %s349_s8, %s349_s8 }
  0x1d   :  { %p356_p0 = por %p355_p13, %p354_p12 }
  0x1f   :  { %p357_p1 = pnand %p356_p0, %p350_p11 }
  0x21   :  { %360 = shalt.err (!%p357_p1)
}
  0x22   :  { %37 = dma.hbm_to_vmem [thread:$0]  %s464_s2, 1024, %s32_s27, [#allocation7], %s390_s22, %s390_s22, %s391_s23  }
  0x23   :  { %383 = dma.done.wait [#allocation4], 1024  }
  0x24   :  { %384 = vsyncadd [#allocation4], 4294966272 }
  0x25   :  { %385 = dma.done.wait [#allocation7], 1024  }
  0x26   :  { %386 = vsyncadd [#allocation7], 4294966272  ;;  %v44_v0 = vld [vmem:[#allocation6] sm:$0xff]  ;;  %v46_v1 = vld [vmem:[#allocation6 + $0x10] sm:$0xff]  ;;  %v133_v59 = vstv %s462_s0  ;;  %s393_s0 = smov [#allocation8]  }
  0x27   :  { %v52_v2 = vadd.f32 1e-08, %v44_v0  ;;  %v54_v3 = vadd.f32 1e-08, %v46_v1  ;;  %v45_v4 = vld [vmem:[#allocation6 + $0x8] sm:$0xff]  ;;  %v47_v6 = vld [vmem:[#allocation6 + $0x18] sm:$0xff] }
  0x28   :  { %v53_v5 = vadd.f32 1e-08, %v45_v4  ;;  %v55_v7 = vadd.f32 1e-08, %v47_v6  ;;  %v48_v8 = vld [vmem:[#allocation6 + $0x20] sm:$0xff]  ;;  %v49_v9 = vld [vmem:[#allocation6 + $0x28] sm:$0xff] }
  0x29   :  { %253 = vlog2.f32 %v52_v2  ;;  %v56_v10 = vadd.f32 1e-08, %v48_v8  ;;  %v57_v11 = vadd.f32 1e-08, %v49_v9  ;;  %v50_v12 = vld [vmem:[#allocation6 + $0x30] sm:$0xff]  ;;  %v51_v14 = vld [vmem:[#allocation6 + $0x38] sm:$0xff] }
  0x2a   :  { %255 = vlog2.f32 %v54_v3  ;;  %v58_v13 = vadd.f32 1e-08, %v50_v12  ;;  %v59_v15 = vadd.f32 1e-08, %v51_v14  ;;  %v117_v52 = vld [vmem:[#allocation3] sm:$0xff]  ;;  %v119_v56 = vld [vmem:[#allocation3 + $0x10] sm:$0xff] }
  0x2b   :  { %257 = vlog2.f32 %v53_v5  ;;  %v118_v61 = vld [vmem:[#allocation3 + $0x8] sm:$0xff]  ;;  %v120_v2 = vld [vmem:[#allocation3 + $0x18] sm:$0xff]  ;;  %s235_s11 = sshll.u32 %s393_s0, 4  ;;  %s236_s11 = int_to_ptr.vmem [resolvable:$true] %s235_s11 }
  0x2c   :  { %259 = vlog2.f32 %v55_v7  ;;  %v121_v7 = vld [vmem:[#allocation3 + $0x20] sm:$0xff]  ;;  %s361_s12 = scalar_lea.vmem %s236_s11, 1024  ;;  %p366_p3 = scmp.lt.s32.totalorder %s236_s11, %s236_s11 }
  0x2d   :  { %261 = vlog2.f32 %v56_v10  ;;  %p362_p2 = scmp.ne.s32.totalorder %s236_s11, %s361_s12  ;;  %p367_p4 = scmp.lt.s32.totalorder %s361_s12, %s361_s12 }
  0x2e   :  { %263 = vlog2.f32 %v57_v11 }
  0x2f   :  { %265 = vlog2.f32 %v58_v13  ;;  %v122_v13 = vld [vmem:[#allocation3 + $0x28] sm:$0xff]  ;;  %p368_p5 = por %p367_p4, %p366_p3 }
  0x30   :  { %267 = vlog2.f32 %v59_v15 }
  0x31   :  { %p369_p6 = pnand %p368_p5, %p362_p2 }
  0x33   :  { %v254_v16 = vpop.eup %253 }
  0x34   :  { %v256_v17 = vpop.eup %255  ;;  %v61_v18 = vmul.f32 0.6931472, %v254_v16 }
  0x35   :  { %v258_v19 = vpop.eup %257  ;;  %v65_v20 = vmul.f32 0.6931472, %v256_v17 }
  0x36   :  { %v260_v21 = vpop.eup %259  ;;  %v76_v22 = vsub.f32 0.0, %v61_v18  ;;  %v63_v23 = vmul.f32 0.6931472, %v258_v19 }
  0x37   :  { %v262_v24 = vpop.eup %261  ;;  %v78_v25 = vsub.f32 0.0, %v65_v20  ;;  %v67_v26 = vmul.f32 0.6931472, %v260_v21 }
  0x38   :  { %v264_v27 = vpop.eup %263  ;;  %v84_v28 = vadd.f32 1e-08, %v76_v22  ;;  %v77_v29 = vsub.f32 0.0, %v63_v23  ;;  %v69_v30 = vmul.f32 0.6931472, %v262_v24  ;;  %v123_v24 = vld [vmem:[#allocation3 + $0x30] sm:$0xff] }
  0x39   :  { %v266_v31 = vpop.eup %265  ;;  %v86_v32 = vadd.f32 1e-08, %v78_v25  ;;  %v79_v33 = vsub.f32 0.0, %v67_v26  ;;  %v71_v34 = vmul.f32 0.6931472, %v264_v27  ;;  %v124_v26 = vld [vmem:[#allocation3 + $0x38] sm:$0xff] }
  0x3a   :  { %v268_v35 = vpop.eup %267  ;;  %269 = vlog2.f32 %v84_v28  ;;  %v85_v36 = vadd.f32 1e-08, %v77_v29  ;;  %v80_v37 = vsub.f32 0.0, %v69_v30  ;;  %v73_v38 = vmul.f32 0.6931472, %v266_v31 }
  0x3b   :  { %271 = vlog2.f32 %v86_v32  ;;  %v87_v39 = vadd.f32 1e-08, %v79_v33  ;;  %v81_v40 = vsub.f32 0.0, %v71_v34  ;;  %v75_v41 = vmul.f32 0.6931472, %v268_v35 }
  0x3c   :  { %273 = vlog2.f32 %v85_v36  ;;  %v88_v42 = vadd.f32 1e-08, %v80_v37  ;;  %v82_v43 = vsub.f32 0.0, %v73_v38 }
  0x3d   :  { %275 = vlog2.f32 %v87_v39  ;;  %v89_v44 = vadd.f32 1e-08, %v81_v40  ;;  %v83_v45 = vsub.f32 0.0, %v75_v41 }
  0x3e   :  { %277 = vlog2.f32 %v88_v42  ;;  %v90_v46 = vadd.f32 1e-08, %v82_v43 }
  0x3f   :  { %279 = vlog2.f32 %v89_v44  ;;  %v91_v47 = vadd.f32 1e-08, %v83_v45 }
  0x40   :  { %281 = vlog2.f32 %v90_v46 }
  0x41   :  { %283 = vlog2.f32 %v91_v47 }
  0x44   :  { %v270_v48 = vpop.eup %269 }
  0x45   :  { %v272_v49 = vpop.eup %271  ;;  %v93_v50 = vmul.f32 0.6931472, %v270_v48 }
  0x46   :  { %v274_v51 = vpop.eup %273  ;;  %v97_v53 = vmul.f32 0.6931472, %v272_v49 }
  0x47   :  { %v276_v54 = vpop.eup %275  ;;  %v108_v55 = vsub.f32 0.0, %v93_v50  ;;  %v95_v57 = vmul.f32 0.6931472, %v274_v51 }
  0x48   :  { %v278_v58 = vpop.eup %277  ;;  %v110_v60 = vsub.f32 0.0, %v97_v53  ;;  %v99_v62 = vmul.f32 0.6931472, %v276_v54 }
  0x49   :  { %v280_v63 = vpop.eup %279  ;;  %v125_v0 = vadd.f32 %v117_v52, %v108_v55  ;;  %v109_v1 = vsub.f32 0.0, %v95_v57  ;;  %v101_v3 = vmul.f32 0.6931472, %v278_v58 }
  0x4a   :  { %v282_v4 = vpop.eup %281  ;;  %v127_v5 = vadd.f32 %v119_v56, %v110_v60  ;;  %v111_v6 = vsub.f32 0.0, %v99_v62  ;;  %v103_v8 = vmul.f32 0.6931472, %v280_v63 }
  0x4b   :  { %v284_v9 = vpop.eup %283  ;;  %v134_v10 = vmul.f32 %v133_v59, %v125_v0  ;;  %v126_v11 = vadd.f32 %v118_v61, %v109_v1  ;;  %v112_v12 = vsub.f32 0.0, %v101_v3  ;;  %v105_v14 = vmul.f32 0.6931472, %v282_v4 }
  0x4c   :  { %v136_v15 = vmul.f32 %v133_v59, %v127_v5  ;;  %v128_v16 = vadd.f32 %v120_v2, %v111_v6  ;;  %v113_v17 = vsub.f32 0.0, %v103_v8  ;;  %v107_v18 = vmul.f32 0.6931472, %v284_v9 }
  0x4d   :  { %142 = vmax.xlane.f32.xlu0 %v134_v10  ;;  %v135_v19 = vmul.f32 %v133_v59, %v126_v11  ;;  %v129_v20 = vadd.f32 %v121_v7, %v112_v12  ;;  %v114_v21 = vsub.f32 0.0, %v105_v14 }
  0x4e   :  { %146 = vmax.xlane.f32.xlu1 %v136_v15  ;;  %v137_v22 = vmul.f32 %v133_v59, %v128_v16  ;;  %v130_v23 = vadd.f32 %v122_v13, %v113_v17  ;;  %v115_v25 = vsub.f32 0.0, %v107_v18 }
  0x4f   :  { %v138_v27 = vmul.f32 %v133_v59, %v129_v20  ;;  %v131_v28 = vadd.f32 %v123_v24, %v114_v21 }
  0x50   :  { %v139_v29 = vmul.f32 %v133_v59, %v130_v23  ;;  %v132_v30 = vadd.f32 %v124_v26, %v115_v25 }
  0x51   :  { %144 = vmax.xlane.f32.xlu0 %v135_v19  ;;  %v140_v31 = vmul.f32 %v133_v59, %v131_v28 }
  0x52   :  { %148 = vmax.xlane.f32.xlu1 %v137_v22  ;;  %v141_v32 = vmul.f32 %v133_v59, %v132_v30 }
  0x55   :  { %150 = vmax.xlane.f32.xlu0 %v138_v27 }
  0x56   :  { %152 = vmax.xlane.f32.xlu1 %v139_v29 }
  0x59   :  { %154 = vmax.xlane.f32.xlu0 %v140_v31 }
  0x5a   :  { %156 = vmax.xlane.f32.xlu1 %v141_v32 }
  0xda   :  { %v143_v33 = vpop.xlane.xlu0 %142 }
  0xdb   :  { %v158_v34 = vsub.f32 %v134_v10, %v143_v33  ;;  %v147_v35 = vpop.xlane.xlu1 %146 }
  0xdc   :  { %v160_v36 = vsub.f32 %v136_v15, %v147_v35 }
  0xdd   :  { %v166_v37 = vmul.f32 1.442695, %v158_v34 }
  0xde   :  { %v170_v38 = vmul.f32 1.442695, %v160_v36  ;;  %v145_v39 = vpop.xlane.xlu0 %144 }
  0xdf   :  { %285 = vpow2.f32 %v166_v37  ;;  %v159_v40 = vsub.f32 %v135_v19, %v145_v39  ;;  %v149_v41 = vpop.xlane.xlu1 %148 }
  0xe0   :  { %v161_v42 = vsub.f32 %v137_v22, %v149_v41  ;;  %287 = vpow2.f32 %v170_v38 }
  0xe1   :  { %v168_v43 = vmul.f32 1.442695, %v159_v40 }
  0xe2   :  { %v172_v44 = vmul.f32 1.442695, %v161_v42  ;;  %v151_v45 = vpop.xlane.xlu0 %150 }
  0xe3   :  { %289 = vpow2.f32 %v168_v43  ;;  %v162_v46 = vsub.f32 %v138_v27, %v151_v45  ;;  %v153_v47 = vpop.xlane.xlu1 %152 }
  0xe4   :  { %v163_v48 = vsub.f32 %v139_v29, %v153_v47  ;;  %291 = vpow2.f32 %v172_v44 }
  0xe5   :  { %v174_v49 = vmul.f32 1.442695, %v162_v46 }
  0xe6   :  { %v176_v50 = vmul.f32 1.442695, %v163_v48  ;;  %v155_v51 = vpop.xlane.xlu0 %154 }
  0xe7   :  { %293 = vpow2.f32 %v174_v49  ;;  %v164_v52 = vsub.f32 %v140_v31, %v155_v51  ;;  %v157_v53 = vpop.xlane.xlu1 %156 }
  0xe8   :  { %v165_v54 = vsub.f32 %v141_v32, %v157_v53  ;;  %295 = vpow2.f32 %v176_v50 }
  0xe9   :  { %v286_v55 = vpop.eup %285  ;;  %v178_v56 = vmul.f32 1.442695, %v164_v52 }
  0xea   :  { %v180_v57 = vmul.f32 1.442695, %v165_v54  ;;  %182 = vadd.xlane.f32.xlu0 %v286_v55  ;;  %v288_v58 = vpop.eup %287 }
  0xeb   :  { %297 = vpow2.f32 %v178_v56 }
  0xec   :  { %299 = vpow2.f32 %v180_v57 }
  0xed   :  { %v290_v59 = vpop.eup %289 }
  0xee   :  { %186 = vadd.xlane.f32.xlu0 %v288_v58  ;;  %184 = vadd.xlane.f32.xlu1 %v290_v59  ;;  %v292_v60 = vpop.eup %291 }
  0xf1   :  { %v294_v61 = vpop.eup %293 }
  0xf2   :  { %188 = vadd.xlane.f32.xlu1 %v292_v60  ;;  %190 = vadd.xlane.f32.xlu0 %v294_v61  ;;  %v296_v62 = vpop.eup %295 }
  0xf5   :  { %v298_v63 = vpop.eup %297 }
  0xf6   :  { %192 = vadd.xlane.f32.xlu1 %v296_v62  ;;  %194 = vadd.xlane.f32.xlu0 %v298_v63  ;;  %v300_v0 = vpop.eup %299 }
  0xfa   :  { %196 = vadd.xlane.f32.xlu1 %v300_v0 }
 0x177   :  { %v183_v1 = vpop.xlane.xlu0 %182 }
 0x178   :  { %301 = vrcp.f32 %v183_v1 }
 0x17b   :  { %v185_v2 = vpop.xlane.xlu1 %184  ;;  %v187_v3 = vpop.xlane.xlu0 %186 }
 0x17c   :  { %303 = vrcp.f32 %v185_v2 }
 0x17d   :  { %305 = vrcp.f32 %v187_v3 }
 0x17f   :  { %v189_v4 = vpop.xlane.xlu1 %188  ;;  %v191_v5 = vpop.xlane.xlu0 %190 }
 0x180   :  { %307 = vrcp.f32 %v189_v4 }
 0x181   :  { %309 = vrcp.f32 %v191_v5 }
 0x182   :  { %v302_v6 = vpop.eup %301 }
 0x183   :  { %v214_v7 = vmul.f32 %v302_v6, %v286_v55  ;;  %v193_v8 = vpop.xlane.xlu1 %192  ;;  %v195_v9 = vpop.xlane.xlu0 %194 }
 0x184   :  { %311 = vrcp.f32 %v193_v8 }
 0x185   :  { %222 = vst [vmem:[#allocation8] sm:$0xff] %v214_v7  ;;  %313 = vrcp.f32 %v195_v9 }
 0x186   :  { %v304_v10 = vpop.eup %303 }
 0x187   :  { %v306_v11 = vpop.eup %305  ;;  %v215_v12 = vmul.f32 %v304_v10, %v290_v59  ;;  %v197_v13 = vpop.xlane.xlu1 %196 }
 0x188   :  { %v216_v14 = vmul.f32 %v306_v11, %v288_v58  ;;  %315 = vrcp.f32 %v197_v13 }
 0x189   :  { %223 = vst [vmem:[#allocation8 + $0x8] sm:$0xff] %v215_v12 }
 0x18a   :  { %v308_v15 = vpop.eup %307  ;;  %224 = vst [vmem:[#allocation8 + $0x10] sm:$0xff] %v216_v14 }
 0x18b   :  { %v310_v16 = vpop.eup %309  ;;  %v217_v17 = vmul.f32 %v308_v15, %v292_v60 }
 0x18c   :  { %v218_v18 = vmul.f32 %v310_v16, %v294_v61 }
 0x18d   :  { %225 = vst [vmem:[#allocation8 + $0x18] sm:$0xff] %v217_v17 }
 0x18e   :  { %v312_v19 = vpop.eup %311  ;;  %226 = vst [vmem:[#allocation8 + $0x20] sm:$0xff] %v218_v18 }
 0x18f   :  { %v314_v20 = vpop.eup %313  ;;  %v219_v21 = vmul.f32 %v312_v19, %v296_v62 }
 0x190   :  { %v220_v22 = vmul.f32 %v314_v20, %v298_v63 }
 0x191   :  { %227 = vst [vmem:[#allocation8 + $0x28] sm:$0xff] %v219_v21 }
 0x192   :  { %v316_v23 = vpop.eup %315  ;;  %228 = vst [vmem:[#allocation8 + $0x30] sm:$0xff] %v220_v22 }
 0x193   :  { %v221_v24 = vmul.f32 %v316_v23, %v300_v0 }
 0x195   :  { %229 = vst [vmem:[#allocation8 + $0x38] sm:$0xff] %v221_v24 }
 0x196   :  { %372 = shalt.err (!%p369_p6)
}
 0x197   :  { %s373_s15 = scalar_lea.hbm %s465_s3, 1024 }
 0x198   :  { %p374_p7 = scmp.ne.s32.totalorder %s465_s3, %s373_s15  ;;  %p377_p8 = scmp.lt.u32.totalorder %s373_s15, %s465_s3 }
 0x19a   :  { %p379_p9 = pnand %p377_p8, %p374_p7 }
 0x19c   :  { %382 = shalt.err (!%p379_p9)
}
 0x19d   :  { %241 = dma.vmem_to_hbm [thread:$0]  %s236_s11, 1024, %s465_s3, [#allocation5], %s390_s22, %s390_s22, %s391_s23  }
 0x19e   :  { %387 = dma.done.wait [#allocation5], 1024  }
 0x19f   :  { %388 = vsyncadd [#allocation5], 4294966272 }
 0x1a0   :  { %245 = vsyncpa [#allocation4], 1 }
 0x1a1   :  { %246 = vsyncpa [#allocation7], 1 }
 0x1a2   :  { %247 = vsyncpa [#allocation5], 1 }

</bundles_post_ra>
